<compile_context>
chip_gen: v7x
topology: tpu7x:2x2x1
jax: 0.10.0
libtpu: 0.0.40
codegen_flags: <defaults>
</compile_context>

<pallas_src>
import jax
import jax.numpy as jnp
from jax.experimental import pallas as pl
from jax.experimental.pallas import tpu as pltpu


def _round_up(x, m):
    return ((x + m - 1) // m) * m


def _cdiv(a, b):
    return -(-a // b)


def _tpu_generation():
    """Best-effort TPU generation (5/6/7...); defaults to 6 if unknown."""
    try:
        kind = jax.devices()[0].device_kind.lower()
    except Exception:
        return 6
    for g in (7, 6, 5, 4):
        if f"v{g}" in kind:
            return g
    return 6


def _vmem_plan(gen):
    """Return (tile-planning budget, scoped vmem_limit_bytes) for this chip."""
    try:
        cap = int(pltpu.get_tpu_info().vmem_capacity_bytes)
    except Exception:
        cap = (64 if gen >= 7 else 128) * 1024 * 1024
    # ~56 MiB scoped limit on v7x (64 MiB physical), ~112 MiB on v5e/v6e (128 MiB).
    limit = min(cap - 8 * 1024 * 1024, 112 * 1024 * 1024)
    # Leave headroom under the scoped limit for Mosaic internal scratch.
    budget = limit - 8 * 1024 * 1024
    return budget, limit


def ffn_kernel(x_ref, w1_ref, b1_ref, w2_ref, b2_ref, o_ref, acc_ref):
    # x_ref : (tm, Dp)   input row tile (compute dtype)
    # w1_ref: (Dp, th)   first-linear column tile, (in, out) layout
    # b1_ref: (1, th)    bf16 on v6e/v7x bf16 path, f32 otherwise
    # w2_ref: (th, Dp)   second-linear row tile
    # b2_ref: (1, Dp)    f32
    # o_ref : (tm, Dp)   output tile (x.dtype)
    # acc_ref: (tm, Dp)  f32 VMEM accumulator, resident across the hidden axis
    j = pl.program_id(1)

    @pl.when(j == 0)
    def _init():
        # Fold the second bias into the accumulator init: keeps the inner loop
        # pure MXU + bias/ReLU, no per-step b2 broadcast.
        acc_ref[...] = jnp.broadcast_to(b2_ref[...].astype(jnp.float32),
                                        acc_ref.shape)

    # First GEMM on the MXU, f32 accumulation.
    h = jnp.dot(x_ref[...], w1_ref[...], preferred_element_type=jnp.float32)
    # Bias + ReLU in b1's dtype: bf16 on v6e/v7x (bf16 VPU, halves vreg traffic
    # and removes the separate downcast), f32 on v5e (no bf16 VPU).
    h = jnp.maximum(h.astype(b1_ref.dtype) + b1_ref[...], 0).astype(w2_ref.dtype)
    # Second GEMM, accumulated in f32.
    acc_ref[...] += jnp.dot(h, w2_ref[...], preferred_element_type=jnp.float32)

    @pl.when(j == pl.num_programs(1) - 1)
    def _store():
        # nn.Dropout in eval mode == identity.
        o_ref[...] = acc_ref[...].astype(o_ref.dtype)


def _choose_tiles(M, D_pad, H, itemsize, out_itemsize, sublane, budget,
                  num_cores, th_align):
    """Pick (tm, th).

    Policy: (1) minimize M padding while giving every TensorCore a row tile,
    (2) prefer th == H_pad so W1/W2 stay VMEM-resident (fetched once total),
    (3) if over budget shrink th first, tm last (bigger tm = more weight reuse
    when weights have to stream).
    """
    H_base = _round_up(H, 128)
    TM_CAP = 1024

    def footprint(tm_, th_):
        w = 2 * 2 * D_pad * th_ * itemsize                   # W1+W2 tiles, double-buffered
        io = 2 * tm_ * D_pad * (itemsize + out_itemsize)     # x + out tiles, double-buffered
        acc = tm_ * D_pad * 4                                 # f32 accumulator scratch
        hid = tm_ * th_ * (4 + itemsize)                      # f32 h + downcast copy
        bias = 2 * 2 * (th_ + D_pad) * 4
        return w + io + acc + hid + bias

    def pick_tm(cap):
        cap = max(sublane, min(cap, _round_up(M, sublane)))
        n_rows = _cdiv(M, cap)
        if M >= num_cores * sublane:
            n_rows = max(n_rows, num_cores)   # keep both v7x TCs busy
        return _round_up(_cdiv(M, n_rows), sublane)

    def pick_th(tm_):
        n_h = 1
        while True:
            cand = _cdiv(H_base, n_h)
            align = th_align if cand >= th_align else 128
            cand = _round_up(cand, align)
            if footprint(tm_, cand) <= budget or cand <= 128:
                return cand
            n_h += 1

    tm = pick_tm(TM_CAP)
    th = pick_th(tm)
    while footprint(tm, th) > budget and tm > sublane:
        tm = pick_tm(max(sublane, tm // 2))
        th = pick_th(tm)
    return tm, th


def _pad2d(a, rows, cols):
    pr, pc = rows - a.shape[0], cols - a.shape[1]
    if pr == 0 and pc == 0:
        return a
    return jnp.pad(a, ((0, pr), (0, pc)))


def feed_forward(x, w1, b1, w2, b2, *, compute_dtype=None,
                 vmem_budget_bytes=None):
    """x: (B, T, D).  w1: (D, H), b1: (H,), w2: (H, D), b2: (D,), H = 4*D.

    compute_dtype: MXU operand dtype.  Defaults to bf16 when x is f32 (f32
    accumulation always); pass jnp.float32 to force full-precision compute.
    vmem_budget_bytes: optional override of the tile-planning budget (testing).
    """
    B, T, D = x.shape
    H = w1.shape[1]
    M = B * T

    gen = _tpu_generation()
    num_cores = 2 if gen >= 7 else 1
    budget, vmem_limit = _vmem_plan(gen)
    if vmem_budget_bytes is not None:
        budget = vmem_budget_bytes

    if compute_dtype is None:
        # MXU is bf16-native on v5e/v6e/v7x: f32 matmul is far slower and
        # doubles weight HBM bytes, so default f32 inputs to bf16 compute.
        cdtype = (jnp.dtype(jnp.bfloat16) if x.dtype == jnp.float32
                  else jnp.dtype(x.dtype))
    else:
        cdtype = jnp.dtype(compute_dtype)
    itemsize = cdtype.itemsize
    out_dtype = jnp.dtype(x.dtype)
    out_itemsize = out_dtype.itemsize
    sublane = {4: 8, 2: 16, 1: 32}.get(itemsize, 8)

    # Lane-dense padding (unmasked vst).  D_pad stays 128-aligned (it scales x
    # and output HBM traffic); th is 256-aligned on v6e/v7x for the 2x256^2 MXU.
    D_pad = _round_up(D, 128)
    th_align = 256 if gen >= 6 else 128
    tm, th = _choose_tiles(M, D_pad, H, itemsize, out_itemsize, sublane,
                           budget, num_cores, th_align)
    M_pad = _round_up(M, tm)
    H_pad = _round_up(H, th)
    n_row_tiles = M_pad // tm
    n_hidden_tiles = H_pad // th

    # bf16 bias/ReLU epilogue only where the VPU has bf16 ALUs (v6e/v7x).
    b1_dtype = cdtype if (cdtype == jnp.dtype(jnp.bfloat16) and gen >= 6) else jnp.dtype(jnp.float32)

    x2d = _pad2d(x.reshape(M, D).astype(cdtype), M_pad, D_pad)
    w1p = _pad2d(w1.astype(cdtype), D_pad, H_pad)
    w2p = _pad2d(w2.astype(cdtype), H_pad, D_pad)
    b1p = _pad2d(b1.astype(b1_dtype).reshape(1, H), 1, H_pad)
    b2p = _pad2d(b2.astype(jnp.float32).reshape(1, D), 1, D_pad)

    # Weights are fetched once when the hidden axis is collapsed (index map is
    # constant across the whole grid); otherwise once per row tile.
    weight_bytes = (w1p.size + w2p.size) * itemsize
    weight_streams = 1 if n_hidden_tiles == 1 else n_row_tiles
    bytes_accessed = (
        x2d.size * itemsize
        + weight_streams * weight_bytes
        + b1p.size * jnp.dtype(b1_dtype).itemsize
        + b2p.size * 4
        + M_pad * D_pad * out_itemsize
    )

    out2d = pl.pallas_call(
        ffn_kernel,
        out_shape=jax.ShapeDtypeStruct((M_pad, D_pad), out_dtype),
        grid=(n_row_tiles, n_hidden_tiles),
        in_specs=[
            pl.BlockSpec((tm, D_pad), lambda i, j: (i, 0)),   # x row tile
            pl.BlockSpec((D_pad, th), lambda i, j: (0, j)),   # W1 column tile
            pl.BlockSpec((1, th), lambda i, j: (0, j)),       # b1 tile
            pl.BlockSpec((th, D_pad), lambda i, j: (j, 0)),   # W2 row tile
            pl.BlockSpec((1, D_pad), lambda i, j: (0, 0)),    # b2
        ],
        out_specs=pl.BlockSpec((tm, D_pad), lambda i, j: (i, 0)),
        scratch_shapes=[pltpu.VMEM((tm, D_pad), jnp.float32)],
        compiler_params=pltpu.CompilerParams(
            # Row axis shards across the 2 TensorCores on v7x; hidden axis is a
            # reduction (accumulator-resident) so it must be "arbitrary".
            dimension_semantics=("parallel", "arbitrary"),
            vmem_limit_bytes=int(vmem_limit),
        ),
        cost_estimate=pl.CostEstimate(
            flops=4 * M_pad * D_pad * H_pad,   # two GEMMs of 2*M*D*H each
            transcendentals=0,
            bytes_accessed=int(bytes_accessed),
        ),
    )(x2d, w1p, b1p, w2p, b2p)

    return out2d[:M, :D].reshape(B, T, D)


def init_params(key, n_embed, dtype=jnp.float32):
    """PyTorch-default-style uniform init, deterministic via PRNGKey."""
    hidden = 4 * n_embed
    k1, k2, k3, k4 = jax.random.split(key, 4)
    bound1 = 1.0 / jnp.sqrt(n_embed)
    bound2 = 1.0 / jnp.sqrt(hidden)
    # stored pre-transposed: (in, out)
    w1 = jax.random.uniform(k1, (n_embed, hidden), dtype, -bound1, bound1)
    b1 = jax.random.uniform(k2, (hidden,), dtype, -bound1, bound1)
    w2 = jax.random.uniform(k3, (hidden, n_embed), dtype, -bound2, bound2)
    b2 = jax.random.uniform(k4, (n_embed,), dtype, -bound2, bound2)
    return w1, b1, w2, b2


def _ref_ffn(x, w1, b1, w2, b2):
    B, T, D = x.shape
    h = jnp.maximum(x.reshape(-1, D) @ w1 + b1, 0.0)
    return (h @ w2 + b2).reshape(B, T, D)


if __name__ == "__main__":
    key = jax.random.PRNGKey(0)

    # --- small shape matching the module (n_embed=32 -> hidden=128) ---------
    B, T, n_embed = 2, 8, 32
    kx, kp, kx2, kp2 = jax.random.split(key, 4)
    x = jax.random.normal(kx, (B, T, n_embed), jnp.float32)
    w1, b1, w2, b2 = init_params(kp, n_embed)
    ref = _ref_ffn(x, w1, b1, w2, b2)

    # Default path: bf16 MXU operands, f32 accumulation.
    out = jax.block_until_ready(feed_forward(x, w1, b1, w2, b2))
    assert out.shape == (B, T, n_embed)
    assert jnp.allclose(out, ref, atol=5e-2, rtol=5e-2)

    # Forced f32 compute path: tight tolerance.
    out_f32 = jax.block_until_ready(
        feed_forward(x, w1, b1, w2, b2, compute_dtype=jnp.float32))
    assert jnp.allclose(out_f32, ref, atol=1e-5, rtol=1e-5)

    # --- second shape with a tiny VMEM budget to exercise the tiled
    # (streaming-weights, multi-row-tile, hidden-accumulator) path -----------
    B2, T2, n_embed2 = 2, 128, 256
    x2 = jax.random.normal(kx2, (B2, T2, n_embed2), jnp.float32)
    w1b, b1b, w2b, b2b = init_params(kp2, n_embed2)
    ref2 = _ref_ffn(x2, w1b, b1b, w2b, b2b)
    out2 = jax.block_until_ready(
        feed_forward(x2, w1b, b1b, w2b, b2b, compute_dtype=jnp.float32,
                     vmem_budget_bytes=2 * 1024 * 1024))
    assert out2.shape == (B2, T2, n_embed2)
    assert jnp.allclose(out2, ref2, atol=1e-4, rtol=1e-4)

    print("KERNEL_OK")
</pallas_src>

<mosaic_0001>
module attributes {stable_mosaic.version = 11 : i64} {
  func.func @ffn_kernel(%arg0: i32, %arg1: i32, %arg2: memref<16x128xbf16, #tpu.memory_space<vmem>>, %arg3: memref<128x128xbf16, #tpu.memory_space<vmem>>, %arg4: memref<1x128xbf16, #tpu.memory_space<vmem>>, %arg5: memref<128x128xbf16, #tpu.memory_space<vmem>>, %arg6: memref<1x128xf32, #tpu.memory_space<vmem>>, %arg7: memref<16x128xf32, #tpu.memory_space<vmem>>, %arg8: memref<16x128xf32, #tpu.memory_space<vmem>>) attributes {dimension_semantics = [#tpu.dimension_semantics<parallel>, #tpu.dimension_semantics<arbitrary>], iteration_bounds = array<i64: 1, 1>, scalar_prefetch = 0 : i64, scratch_operands = 1 : i64, tpu.core_type = #tpu.core_type<tc>, window_params = [{transform_indices = @transform_0, window_bounds = array<i64: 16, 128>}, {transform_indices = @transform_1, window_bounds = array<i64: 128, 128>}, {transform_indices = @transform_2, window_bounds = array<i64: 1, 128>}, {transform_indices = @transform_3, window_bounds = array<i64: 128, 128>}, {pipeline_mode = #tpu.pipeline_mode<synchronous>, transform_indices = @transform_4, window_bounds = array<i64: 1, 128>}, {transform_indices = @transform_5, window_bounds = array<i64: 16, 128>}]} {
    %c0_i32 = arith.constant 0 : i32
    %0 = arith.cmpi eq, %arg1, %c0_i32 : i32
    %1 = arith.extui %0 : i1 to i32
    %c0_i32_0 = arith.constant 0 : i32
    %2 = arith.cmpi ne, %1, %c0_i32_0 : i32
    scf.if %2 {
      %c0_16 = arith.constant 0 : index
      %c0_17 = arith.constant 0 : index
      %20 = vector.load %arg6[%c0_16, %c0_17] : memref<1x128xf32, #tpu.memory_space<vmem>>, vector<1x128xf32>
      %21 = vector.shape_cast %20 : vector<1x128xf32> to vector<1x128xf32>
      %22 = vector.broadcast %21 : vector<1x128xf32> to vector<16x128xf32>
      %c0_18 = arith.constant 0 : index
      %c0_19 = arith.constant 0 : index
      %23 = vector.load %arg8[%c0_18, %c0_19] : memref<16x128xf32, #tpu.memory_space<vmem>>, vector<16x128xf32>
      tpu.vector_store %arg8[%c0_18, %c0_19], %22 {strides = array<i32>} : memref<16x128xf32, #tpu.memory_space<vmem>>, vector<16x128xf32>,
    } else {
    }
    %c0 = arith.constant 0 : index
    %c0_1 = arith.constant 0 : index
    %3 = vector.load %arg2[%c0, %c0_1] : memref<16x128xbf16, #tpu.memory_space<vmem>>, vector<16x128xbf16>
    %c0_2 = arith.constant 0 : index
    %c0_3 = arith.constant 0 : index
    %4 = vector.load %arg3[%c0_2, %c0_3] : memref<128x128xbf16, #tpu.memory_space<vmem>>, vector<128x128xbf16>
    %cst = arith.constant dense<0.000000e+00> : vector<16x128xf32>
    %5 = tpu.matmul %3, %4, %cst {dimension_numbers = #tpu.dot_dimension_numbers<[1], [0], [0], [1], [0, 0, 1, 1], [], []>} : vector<16x128xbf16>, vector<128x128xbf16>, vector<16x128xf32> -> vector<16x128xf32>
    %6 = arith.truncf %5 : vector<16x128xf32> to vector<16x128xbf16>
    %c0_4 = arith.constant 0 : index
    %c0_5 = arith.constant 0 : index
    %7 = vector.load %arg4[%c0_4, %c0_5] : memref<1x128xbf16, #tpu.memory_space<vmem>>, vector<1x128xbf16>
    %8 = vector.broadcast %7 : vector<1x128xbf16> to vector<16x128xbf16>
    %9 = arith.addf %6, %8 : vector<16x128xbf16>
    %cst_6 = arith.constant 0.000000e+00 : bf16
    %10 = vector.broadcast %cst_6 : bf16 to vector<16x128xbf16>
    %11 = arith.maximumf %9, %10 : vector<16x128xbf16>
    %c0_7 = arith.constant 0 : index
    %c0_8 = arith.constant 0 : index
    %12 = vector.load %arg8[%c0_7, %c0_8] : memref<16x128xf32, #tpu.memory_space<vmem>>, vector<16x128xf32>
    %c0_9 = arith.constant 0 : index
    %c0_10 = arith.constant 0 : index
    %13 = vector.load %arg5[%c0_9, %c0_10] : memref<128x128xbf16, #tpu.memory_space<vmem>>, vector<128x128xbf16>
    %cst_11 = arith.constant dense<0.000000e+00> : vector<16x128xf32>
    %14 = tpu.matmul %11, %13, %cst_11 {dimension_numbers = #tpu.dot_dimension_numbers<[1], [0], [0], [1], [0, 0, 1, 1], [], []>} : vector<16x128xbf16>, vector<128x128xbf16>, vector<16x128xf32> -> vector<16x128xf32>
    %15 = arith.addf %12, %14 : vector<16x128xf32>
    %c0_12 = arith.constant 0 : index
    %c0_13 = arith.constant 0 : index
    %16 = vector.load %arg8[%c0_12, %c0_13] : memref<16x128xf32, #tpu.memory_space<vmem>>, vector<16x128xf32>
    tpu.vector_store %arg8[%c0_12, %c0_13], %15 {strides = array<i32>} : memref<16x128xf32, #tpu.memory_space<vmem>>, vector<16x128xf32>,
    %c0_i32_14 = arith.constant 0 : i32
    %17 = arith.cmpi eq, %arg1, %c0_i32_14 : i32
    %18 = arith.extui %17 : i1 to i32
    %c0_i32_15 = arith.constant 0 : i32
    %19 = arith.cmpi ne, %18, %c0_i32_15 : i32
    scf.if %19 {
      %c0_16 = arith.constant 0 : index
      %c0_17 = arith.constant 0 : index
      %20 = vector.load %arg8[%c0_16, %c0_17] : memref<16x128xf32, #tpu.memory_space<vmem>>, vector<16x128xf32>
      %c0_18 = arith.constant 0 : index
      %c0_19 = arith.constant 0 : index
      %21 = vector.load %arg7[%c0_18, %c0_19] : memref<16x128xf32, #tpu.memory_space<vmem>>, vector<16x128xf32>
      tpu.vector_store %arg7[%c0_18, %c0_19], %20 {strides = array<i32>} : memref<16x128xf32, #tpu.memory_space<vmem>>, vector<16x128xf32>,
    } else {
    }
    return
  }
  func.func @transform_0(%arg0: i32, %arg1: i32) -> (i32, i32) {
    %c0_i32 = arith.constant 0 : i32
    %c0_i32_0 = arith.constant 0 : i32
    return %arg0, %c0_i32 : i32, i32
  }
  func.func @transform_1(%arg0: i32, %arg1: i32) -> (i32, i32) {
    %c0_i32 = arith.constant 0 : i32
    %c0_i32_0 = arith.constant 0 : i32
    return %c0_i32, %arg1 : i32, i32
  }
  func.func @transform_2(%arg0: i32, %arg1: i32) -> (i32, i32) {
    %c0_i32 = arith.constant 0 : i32
    %c0_i32_0 = arith.constant 0 : i32
    return %c0_i32, %arg1 : i32, i32
  }
  func.func @transform_3(%arg0: i32, %arg1: i32) -> (i32, i32) {
    %c0_i32 = arith.constant 0 : i32
    %c0_i32_0 = arith.constant 0 : i32
    return %arg1, %c0_i32 : i32, i32
  }
  func.func @transform_4(%arg0: i32, %arg1: i32) -> (i32, i32) {
    %c0_i32 = arith.constant 0 : i32
    %c0_i32_0 = arith.constant 0 : i32
    %c0_i32_1 = arith.constant 0 : i32
    return %c0_i32, %c0_i32_0 : i32, i32
  }
  func.func @transform_5(%arg0: i32, %arg1: i32) -> (i32, i32) {
    %c0_i32 = arith.constant 0 : i32
    %c0_i32_0 = arith.constant 0 : i32
    return %arg0, %c0_i32 : i32, i32
  }
}

</mosaic_0001>

<bundles_post_ra>
// kernel: tpu_custom_call.1
= control target key start
LH: loop header
LB: loop body
LE: loop exit
PB: predicated region body
PF: predicated region fallthrough
CT: control target
= control target key end

     0   :  { %10 = vsyncpa [#allocation4], 0  ;;  %s737_s0 = inlined_call_operand.hbm [shape: bf16[16,128], index: 0, kind: input, shape index: {}]   ;;  %s738_s1 = inlined_call_operand.hbm [shape: bf16[128,128], index: 1, kind: input, shape index: {}]   ;;  %s739_s2 = inlined_call_operand.hbm [shape: bf16[1,128], index: 2, kind: input, shape index: {}]   ;;  %s740_s3 = inlined_call_operand.hbm [shape: bf16[128,128], index: 3, kind: input, shape index: {}]   ;;  %s741_s4 = inlined_call_operand.hbm [shape: f32[1,128], index: 4, kind: input, shape index: {}]   ;;  %s742_s5 = inlined_call_operand.hbm [shape: f32[16,128], index: 5, kind: output, shape index: {}]  }
   0x1   :  { %11 = vsyncpa [#allocation7], 0 }
   0x2   :  { %12 = vsyncpa [#allocation10], 0 }
   0x3   :  { %13 = vsyncpa [#allocation5], 0  ;;  %s606_s18 = smov [#allocation6]   ;;  %s607_s20 = smov [#allocation9]  }
   0x4   :  { %s31_s19 = sshll.u32 %s606_s18, 4  ;;  %s53_s21 = sshll.u32 %s607_s20, 4  ;;  %s32_s19 = int_to_ptr.vmem [resolvable:$true] %s31_s19  ;;  %s649_s21 = int_to_ptr.vmem [resolvable:$true] %s53_s21 }
   0x5   :  { %s466_s24 = scalar_lea.hbm %s738_s1, 1024 }
   0x6   :  { %p467_p0 = scmp.ne.s32.totalorder %s738_s1, %s466_s24  ;;  %p470_p1 = scmp.lt.u32.totalorder %s466_s24, %s738_s1 }
   0x8   :  { %p472_p2 = pnand %p470_p1, %p467_p0 }
   0xa   :  { %475 = shalt.err (!%p472_p2)
}
   0xb   :  { %s476_s29 = scalar_lea.vmem %s32_s19, 1024  ;;  %p481_p4 = scmp.lt.s32.totalorder %s32_s19, %s32_s19 }
   0xc   :  { %p477_p3 = scmp.ne.s32.totalorder %s32_s19, %s476_s29  ;;  %p482_p5 = scmp.lt.s32.totalorder %s476_s29, %s476_s29 }
   0xe   :  { %p483_p6 = por %p482_p5, %p481_p4 }
  0x10   :  { %p484_p7 = pnand %p483_p6, %p477_p3 }
  0x12   :  { %487 = shalt.err (!%p484_p7)
}
  0x13   :  { %s608_s30 = smov 64   ;;  %s609_s6 = smov 4  }
  0x14   :  { %37 = dma.hbm_to_vmem [thread:$0]  %s738_s1, 1024, %s32_s19, [#allocation7], %s608_s30, %s608_s30, %s609_s6  }
  0x15   :  { %s488_s11 = scalar_lea.hbm %s740_s3, 1024 }
  0x16   :  { %p489_p8 = scmp.ne.s32.totalorder %s740_s3, %s488_s11  ;;  %p492_p9 = scmp.lt.u32.totalorder %s488_s11, %s740_s3 }
  0x18   :  { %p494_p10 = pnand %p492_p9, %p489_p8 }
  0x1a   :  { %497 = shalt.err (!%p494_p10)
}
  0x1b   :  { %s498_s16 = scalar_lea.vmem %s649_s21, 1024  ;;  %p503_p12 = scmp.lt.s32.totalorder %s649_s21, %s649_s21 }
  0x1c   :  { %p499_p11 = scmp.ne.s32.totalorder %s649_s21, %s498_s16  ;;  %p504_p13 = scmp.lt.s32.totalorder %s498_s16, %s498_s16 }
  0x1e   :  { %p505_p0 = por %p504_p13, %p503_p12 }
  0x20   :  { %p506_p1 = pnand %p505_p0, %p499_p11 }
  0x22   :  { %509 = shalt.err (!%p506_p1)
}
  0x23   :  { %59 = dma.hbm_to_vmem [thread:$0]  %s740_s3, 1024, %s649_s21, [#allocation10], %s608_s30, %s608_s30, %s609_s6  }
  0x24   :  { %s610_s18 = smov [#allocation3]   ;;  %s611_s20 = smov [#allocation8]  }
  0x25   :  { %s19_s19 = sshll.u32 %s610_s18, 4  ;;  %s44_s22 = sshll.u32 %s611_s20, 4  ;;  %s20_s19 = int_to_ptr.vmem [resolvable:$true] %s19_s19  ;;  %s45_s22 = int_to_ptr.vmem [resolvable:$true] %s44_s22 }
  0x26   :  { %s510_s25 = scalar_lea.hbm %s737_s0, 128 }
  0x27   :  { %p511_p2 = scmp.ne.s32.totalorder %s737_s0, %s510_s25  ;;  %p514_p3 = scmp.lt.u32.totalorder %s510_s25, %s737_s0 }
  0x29   :  { %p516_p4 = pnand %p514_p3, %p511_p2 }
  0x2b   :  { %519 = shalt.err (!%p516_p4)
}
  0x2c   :  { %s520_s3 = scalar_lea.vmem %s20_s19, 128  ;;  %p525_p6 = scmp.lt.s32.totalorder %s20_s19, %s20_s19 }
  0x2d   :  { %p521_p5 = scmp.ne.s32.totalorder %s20_s19, %s520_s3  ;;  %p526_p7 = scmp.lt.s32.totalorder %s520_s3, %s520_s3 }
  0x2f   :  { %p527_p8 = por %p526_p7, %p525_p6 }
  0x31   :  { %p528_p9 = pnand %p527_p8, %p521_p5 }
  0x33   :  { %531 = shalt.err (!%p528_p9)
}
  0x34   :  { %25 = dma.hbm_to_vmem [thread:$0]  %s737_s0, 128, %s20_s19, [#allocation4], %s608_s30, %s608_s30, %s609_s6  }
  0x35   :  { %s532_s10 = scalar_lea.hbm %s739_s2, 16 }
  0x36   :  { %p533_p10 = scmp.ne.s32.totalorder %s739_s2, %s532_s10  ;;  %p536_p11 = scmp.lt.u32.totalorder %s532_s10, %s739_s2 }
  0x38   :  { %p538_p12 = pnand %p536_p11, %p533_p10 }
  0x3a   :  { %541 = shalt.err (!%p538_p12)
}
  0x3b   :  { %s542_s15 = scalar_lea.vmem %s45_s22, 16  ;;  %s546_s16 = scalar_lea.vmem %s45_s22, 32 }
  0x3c   :  { %p543_p13 = scmp.ne.s32.totalorder %s45_s22, %s542_s15  ;;  %p547_p0 = scmp.lt.s32.totalorder %s45_s22, %s45_s22 }
  0x3d   :  { %p548_p1 = scmp.lt.s32.totalorder %s546_s16, %s542_s15 }
  0x3f   :  { %p549_p2 = por %p548_p1, %p547_p0 }
  0x41   :  { %p550_p3 = pnand %p549_p2, %p543_p13 }
  0x43   :  { %553 = shalt.err (!%p550_p3)
}
  0x44   :  { %47 = dma.hbm_to_vmem [thread:$0]  %s739_s2, 16, %s45_s22, [#allocation7]  }
  0x45   :  { %s612_s6 = smov [#allocation11]   ;;  %s554_s19 = scalar_lea.hbm %s741_s4, 16 }
  0x46   :  { %s66_s1 = sshll.u32 %s612_s6, 4  ;;  %p555_p4 = scmp.ne.s32.totalorder %s741_s4, %s554_s19  ;;  %s67_s1 = int_to_ptr.vmem [resolvable:$true] %s66_s1 }
  0x47   :  { %p558_p5 = scmp.lt.u32.totalorder %s554_s19, %s741_s4 }
  0x49   :  { %p560_p6 = pnand %p558_p5, %p555_p4 }
  0x4b   :  { %563 = shalt.err (!%p560_p6)
}
  0x4c   :  { %s564_s26 = scalar_lea.vmem %s67_s1, 16  ;;  %s568_s2 = scalar_lea.vmem %s67_s1, 32 }
  0x4d   :  { %p565_p7 = scmp.ne.s32.totalorder %s67_s1, %s564_s26  ;;  %p569_p8 = scmp.lt.s32.totalorder %s67_s1, %s67_s1 }
  0x4e   :  { %p570_p9 = scmp.lt.s32.totalorder %s568_s2, %s564_s26 }
  0x50   :  { %p571_p10 = por %p570_p9, %p569_p8 }
  0x52   :  { %p572_p11 = pnand %p571_p10, %p565_p7 }
  0x54   :  { %575 = shalt.err (!%p572_p11)
}
  0x55   :  { %69 = dma.hbm_to_vmem [thread:$0]  %s741_s4, 16, %s67_s1, [#allocation10]  }
  0x56   :  { %598 = dma.done.wait [#allocation4], 128  }
  0x57   :  { %599 = vsyncadd [#allocation4], 4294967168 }
  0x58   :  { %600 = dma.done.wait [#allocation7], 1040  }
  0x59   :  { %601 = vsyncadd [#allocation7], 4294966256 }
  0x5a   :  { %602 = dma.done.wait [#allocation10], 1040  }
  0x5b   :  { %603 = vsyncadd [#allocation10], 4294966256  ;;  %v613_v0 = vmov 0.0   ;;  %vm614_vm0 = vmmov 0   ;;  %v449_v1 = vld [vmem:[#allocation6] sm:$0xff]   ;;  %v450_v2 = vld [vmem:[#allocation6 + $0x8] sm:$0xff]   ;;  %v217_v18 = vlaneseq }
  0x5c   :  { %396 = vmatprep.subr.bf16.mxu0 %v613_v0  ;;  %412 = vmatprep.mubr.msk.bf16.mxu0 %vm614_vm0, %v613_v0  ;;  %v451_v3 = vld [vmem:[#allocation6 + $0x10] sm:$0xff]   ;;  %v458_v4 = vld [vmem:[#allocation9] sm:$0xff]   ;;  %v452_v5 = vld [vmem:[#allocation6 + $0x18] sm:$0xff]   ;;  %v615_v30 = vmov 0   ;;  %s616_s4 = smov [#allocation12]  }
  0x5d   :  { %416 = vmatprep.subr.bf16.mxu1 %v613_v0  ;;  %432 = vmatprep.mubr.msk.bf16.mxu1 %vm614_vm0, %v613_v0  ;;  %v459_v6 = vld [vmem:[#allocation9 + $0x8] sm:$0xff]   ;;  %v453_v7 = vld [vmem:[#allocation6 + $0x20] sm:$0xff]   ;;  %v460_v8 = vld [vmem:[#allocation9 + $0x10] sm:$0xff]   ;;  %v218_v19 = vshrl.u32 %v217_v18, 7  ;;  %s346_s28 = sshll.u32 %s616_s4, 4  ;;  %s347_s28 = int_to_ptr.vmem [resolvable:$true] %s346_s28 }
  0x5e   :  { %397 = vmatpush3.bf16.msra.mxu0 %v449_v1  ;;  %417 = vmatpush3.bf16.msra.mxu1 %v458_v4  ;;  %v454_v9 = vld [vmem:[#allocation6 + $0x28] sm:$0xff]   ;;  %v461_v10 = vld [vmem:[#allocation9 + $0x18] sm:$0xff]   ;;  %v455_v11 = vld [vmem:[#allocation6 + $0x30] sm:$0xff]   ;;  %s576_s29 = scalar_lea.vmem %s347_s28, 256  ;;  %p581_p13 = scmp.lt.s32.totalorder %s347_s28, %s347_s28 }
  0x5f   :  { %398 = vmatprep.subr.bf16.mxu0 %v613_v0  ;;  %418 = vmatprep.subr.bf16.mxu1 %v613_v0  ;;  %v462_v12 = vld [vmem:[#allocation9 + $0x20] sm:$0xff]   ;;  %v456_v13 = vld [vmem:[#allocation6 + $0x38] sm:$0xff]   ;;  %v463_v14 = vld [vmem:[#allocation9 + $0x28] sm:$0xff]   ;;  %v219_v22 = vsub.s32 0, %v218_v19  ;;  %p577_p12 = scmp.ne.s32.totalorder %s347_s28, %s576_s29  ;;  %p582_p0 = scmp.lt.s32.totalorder %s576_s29, %s576_s29 }
  0x60   :  { %v457_v15 = vld [vmem:[#allocation3] sm:$0xff]   ;;  %v213_v20 = vld [vmem:[#allocation8] sm:$0x1]  ;;  %v360_v32 = vld [vmem:[#allocation11] ss:$0 sm:$0xff] }
  0x61   :  { %v464_v16 = vld [vmem:[#allocation9 + $0x30] sm:$0xff]   ;;  %v465_v17 = vld [vmem:[#allocation9 + $0x38] sm:$0xff]   ;;  %v215_v21 = vpack.i.b16 %v213_v20, %v213_v20  ;;  %p583_p1 = por %p582_p0, %p581_p13 }
  0x62   :  { %399 = vmatpush3.bf16.msra.mxu0 %v450_v2  ;;  %419 = vmatpush3.bf16.msra.mxu1 %v459_v6 }
  0x63   :  { %400 = vmatprep.subr.bf16.mxu0 %v613_v0  ;;  %420 = vmatprep.subr.bf16.mxu1 %v613_v0  ;;  %v220_v25 = vrot.slane %v215_v21, %v219_v22  ;;  %p584_p2 = pnand %p583_p1, %p577_p12 }
  0x66   :  { %401 = vmatpush3.bf16.msra.mxu0 %v451_v3  ;;  %421 = vmatpush3.bf16.msra.mxu1 %v460_v8 }
  0x67   :  { %402 = vmatprep.subr.bf16.mxu0 %v613_v0  ;;  %422 = vmatprep.subr.bf16.mxu1 %v613_v0 }
  0x6a   :  { %403 = vmatpush3.bf16.msra.mxu0 %v452_v5  ;;  %423 = vmatpush3.bf16.msra.mxu1 %v461_v10 }
  0x6b   :  { %404 = vmatprep.subr.bf16.mxu0 %v613_v0  ;;  %424 = vmatprep.subr.bf16.mxu1 %v613_v0 }
  0x6e   :  { %405 = vmatpush3.bf16.msra.mxu0 %v453_v7  ;;  %425 = vmatpush3.bf16.msra.mxu1 %v462_v12 }
  0x6f   :  { %406 = vmatprep.subr.bf16.mxu0 %v613_v0  ;;  %426 = vmatprep.subr.bf16.mxu1 %v613_v0 }
  0x72   :  { %407 = vmatpush3.bf16.msra.mxu0 %v454_v9  ;;  %427 = vmatpush3.bf16.msra.mxu1 %v463_v14 }
  0x73   :  { %408 = vmatprep.subr.bf16.mxu0 %v613_v0  ;;  %428 = vmatprep.subr.bf16.mxu1 %v613_v0 }
  0x76   :  { %409 = vmatpush3.bf16.msra.mxu0 %v455_v11  ;;  %429 = vmatpush3.bf16.msra.mxu1 %v464_v16 }
  0x77   :  { %410 = vmatprep.subr.bf16.mxu0 %v613_v0  ;;  %430 = vmatprep.subr.bf16.mxu1 %v613_v0 }
  0x7a   :  { %411 = vmatpush3.bf16.msra.mxu0 %v456_v13  ;;  %431 = vmatpush3.bf16.msra.mxu1 %v465_v17 }
  0x7d   :  { %413 = vmatmul.mubr.bf16.vlgmr.msra.gmra.mrb[0].mxu0 %v457_v15 }
 0x150   :  { %v205_v23 = vpop.f32.mrb[0].mxu0 }
 0x151   :  { %v414_v24 = vpop.f32.mrb[1].mxu0 }
 0x152   :  { %v208_v26 = vpop.f32.mrb[2].mxu0 }
 0x153   :  { %v212_v27 = vpack.c.bf16 %v208_v26, %v205_v23  ;;  %v415_v28 = vpop.f32.mrb[3].mxu0 }
 0x155   :  { %v221_v29 = vadd.bf16 %v220_v25, %v212_v27 }
 0x157   :  { %v222_v31 = vmax.bf16 %v615_v30, %v221_v29 }
 0x159   :  { %433 = vmatmul.mubr.bf16.vlgmr.msra.gmra.mrb[0].mxu1 %v222_v31 }
 0x22c   :  { %v323_v33 = vpop.f32.mrb[0].mxu1 }
 0x22d   :  { %v330_v34 = vadd.f32 %v360_v32, %v323_v33  ;;  %v434_v35 = vpop.f32.mrb[1].mxu1 }
 0x22e   :  { %v326_v36 = vpop.f32.mrb[2].mxu1 }
 0x22f   :  { %339 = vst [vmem:[#allocation12] sm:$0xff] %v330_v34  ;;  %v331_v37 = vadd.f32 %v360_v32, %v326_v36  ;;  %v435_v38 = vpop.f32.mrb[3].mxu1 }
 0x231   :  { %340 = vst [vmem:[#allocation12 + $0x8] sm:$0xff] %v331_v37 }
 0x232   :  { %587 = shalt.err (!%p584_p2)
}
 0x233   :  { %s588_s7 = scalar_lea.hbm %s742_s5, 256 }
 0x234   :  { %p589_p3 = scmp.ne.s32.totalorder %s742_s5, %s588_s7  ;;  %p592_p4 = scmp.lt.u32.totalorder %s588_s7, %s742_s5 }
 0x236   :  { %p594_p5 = pnand %p592_p4, %p589_p3 }
 0x238   :  { %597 = shalt.err (!%p594_p5)
}
 0x239   :  { %s617_s12 = smov 128   ;;  %s618_s13 = smov 8  }
 0x23a   :  { %352 = dma.vmem_to_hbm [thread:$0]  %s347_s28, 256, %s742_s5, [#allocation5], %s617_s12, %s617_s12, %s618_s13  }
 0x23b   :  { %604 = dma.done.wait [#allocation5], 256  }
 0x23c   :  { %605 = vsyncadd [#allocation5], 4294967040 }
 0x23d   :  { %356 = vsyncpa [#allocation4], 1 }
 0x23e   :  { %357 = vsyncpa [#allocation7], 1 }
 0x23f   :  { %358 = vsyncpa [#allocation10], 1 }
 0x240   :  { %359 = vsyncpa [#allocation5], 1 }

</bundles_post_ra>
